<compile_context>
chip_gen: v6e
topology: v6e:2x2x1
jax: 0.10.0
libtpu: 0.0.40
codegen_flags: <defaults>
</compile_context>

<pallas_src>
import math

import jax
import jax.numpy as jnp
import numpy as np
from jax.experimental import pallas as pl
from jax.experimental.pallas import tpu as pltpu


def _round_up(x, m):
    return ((x + m - 1) // m) * m


def _nbytes(shape, dtype):
    return math.prod(shape) * np.dtype(dtype).itemsize


def _tile_footprint(tm, tk, d_model, x_dtype, w_dtype, out_dtype):
    """Explicit VMEM bytes for one grid step (BlockSpec buffers + scratch + temps)."""
    db = 2  # BlockSpec double-buffering
    f = 0
    f += db * _nbytes((tm, d_model), x_dtype)        # x tile
    f += db * _nbytes((d_model, tk), w_dtype)        # W1 chunk
    f += db * _nbytes((1, tk), jnp.float32)          # b1 chunk
    f += db * _nbytes((tk, d_model), w_dtype)        # W2 chunk
    f += db * _nbytes((1, d_model), jnp.float32)     # b2
    f += db * _nbytes((tm, d_model), out_dtype)      # output tile
    f += _nbytes((tm, d_model), jnp.float32)         # resident f32 accumulator
    f += _nbytes((tm, tk), jnp.float32)              # compiler-managed ReLU temp
    f += _nbytes((tm, tk), w_dtype)                  # bf16 cast copy of the temp
    return f


def _select_tiles(M_align, d_model, d_hidden, x_dtype, w_dtype, out_dtype,
                  tm_req, tk_req):
    """Generation-aware tile sizes + VMEM limit."""
    try:
        info = pltpu.get_tpu_info()
        cap = int(getattr(info, "vmem_capacity_bytes", 0)) or (64 << 20)
    except Exception:  # conservative fallback (works on every generation)
        cap = 64 << 20
    budget = int(cap * 0.6)  # explicit tiles; rest = headroom for compiler temps

    # Row tile: arithmetic intensity ~ tm FLOP/byte when weights are re-streamed
    # per row tile.  v7x (64 MiB VMEM, 3.2 TB/s) saturates near tm=512;
    # v5e/v6e (128 MiB) can afford 1024.
    tm_target = tm_req if tm_req is not None else (512 if cap <= (96 << 20) else 1024)
    tm_eff = min(_round_up(tm_target, 16), M_align)

    # Bound dead MXU work from padding the last row tile to <= ~25%.
    while tm_eff > 128:
        pad_rows = (-M_align) % tm_eff
        if 4 * pad_rows <= M_align:
            break
        tm_eff = max(128, _round_up(tm_eff // 2, 16))

    # Legal hidden chunks: divisors of d_hidden that are multiples of 128
    # (lane constraint on the W1 / b1 blocks), plus the full axis.
    divs = [d for d in range(128, d_hidden, 128) if d_hidden % d == 0]
    divs.append(d_hidden)

    tk_target = tk_req
    if tk_target is None:
        tk_target = 2048
        # If the whole (double-buffered) weight set fits comfortably, leave the
        # hidden axis un-tiled: constant W1/W2 block indices => weights are
        # DMA'd from HBM once total instead of once per row tile.
        full_w = 2 * (_nbytes((d_model, d_hidden), w_dtype)
                      + _nbytes((d_hidden, d_model), w_dtype))
        if full_w <= budget // 2:
            tk_target = d_hidden
    fitting = [d for d in divs if d <= tk_target]
    tk_eff = max(fitting) if fitting else min(divs)

    def fp(tm, tk):
        return _tile_footprint(tm, tk, d_model, x_dtype, w_dtype, out_dtype)

    # Shrink until the explicit tile footprint fits the budget.
    while fp(tm_eff, tk_eff) > budget:
        smaller = [d for d in divs if d < tk_eff]
        if smaller and tk_eff > 256:
            tk_eff = max(smaller)
        elif tm_eff >= 256:
            tm_eff = max(128, _round_up(tm_eff // 2, 16))
        else:
            break

    footprint = fp(tm_eff, tk_eff)
    vmem_limit = min(int(cap * 0.85),
                     max(int(1.5 * footprint) + (8 << 20), 32 << 20))
    return tm_eff, tk_eff, vmem_limit


def _ffn_kernel(x_ref, w1_ref, b1_ref, w2_ref, b2_ref, o_ref, acc_ref):
    # x_ref : (tm, d_model)   input dtype (cast to bf16 in-kernel)
    # w1_ref: (d_model, tk)   bf16        b1_ref: (1, tk)      f32
    # w2_ref: (tk, d_model)   bf16        b2_ref: (1, d_model) f32
    # o_ref : (tm, d_model)   output dtype
    # acc_ref: (tm, d_model)  f32 accumulator (resident across the k axis)
    k = pl.program_id(1)

    @pl.when(k == 0)
    def _():
        # Fold the second bias into the accumulator init.
        acc_ref[...] = jnp.broadcast_to(
            b2_ref[...].astype(jnp.float32), acc_ref.shape)

    # Cast x in VMEM (avoids a separate HBM cast pass in the wrapper).
    x = x_ref[...].astype(w1_ref.dtype)
    # First matmul chunk on the MXU with f32 accumulation.
    h = jnp.dot(x, w1_ref[...], preferred_element_type=jnp.float32)
    # Bias + ReLU in f32 (exact per hidden chunk: ReLU is elementwise).
    h = jnp.maximum(h + b1_ref[...].astype(jnp.float32), 0.0)
    # Second matmul chunk; accumulate into the resident f32 scratch.
    acc_ref[...] += jnp.dot(h.astype(w2_ref.dtype), w2_ref[...],
                            preferred_element_type=jnp.float32)

    @pl.when(k == pl.num_programs(1) - 1)
    def _():
        o_ref[...] = acc_ref[...].astype(o_ref.dtype)


def prepare_ffn_params(w1, b1, w2, b2, compute_dtype=jnp.bfloat16):
    """Cast the FFN weights ONCE (call at init time, not per forward call)."""
    return (jnp.asarray(w1, compute_dtype), jnp.asarray(b1, jnp.float32),
            jnp.asarray(w2, compute_dtype), jnp.asarray(b2, jnp.float32))


def positionwise_ffn(x, w1, b1, w2, b2, *, tm=None, tk=None,
                     compute_dtype=jnp.bfloat16, out_dtype=None):
    """x: [..., d_model] -> [..., d_model] (eval-mode FFN, dropout = identity)."""
    *lead, d_model = x.shape
    d_hidden = w1.shape[1]
    assert w1.shape[0] == d_model and w2.shape == (d_hidden, d_model)
    M = math.prod(lead) if lead else 1
    if out_dtype is None:
        out_dtype = x.dtype   # on v7x, pass out_dtype=jnp.bfloat16 to halve writeback

    # Weights should already be bf16 via prepare_ffn_params; cast only as fallback.
    if w1.dtype != compute_dtype:
        w1 = w1.astype(compute_dtype)
    if w2.dtype != compute_dtype:
        w2 = w2.astype(compute_dtype)
    b1_2d = jnp.asarray(b1, jnp.float32).reshape(1, d_hidden)
    b2_2d = jnp.asarray(b2, jnp.float32).reshape(1, d_model)

    M_align = _round_up(M, 16)  # bf16 sublane packing (16, 128)
    tm_eff, tk_eff, vmem_limit = _select_tiles(
        M_align, d_model, d_hidden, x.dtype, w1.dtype, out_dtype, tm, tk)
    M_pad = _round_up(M_align, tm_eff)

    x2d = x.reshape(M, d_model)
    if M_pad != M:
        x2d = jnp.pad(x2d, ((0, M_pad - M), (0, 0)))

    grid = (M_pad // tm_eff, pl.cdiv(d_hidden, tk_eff))

    out2d = pl.pallas_call(
        _ffn_kernel,
        out_shape=jax.ShapeDtypeStruct((M_pad, d_model), out_dtype),
        grid_spec=pltpu.PrefetchScalarGridSpec(
            num_scalar_prefetch=0,
            grid=grid,
            in_specs=[
                pl.BlockSpec((tm_eff, d_model), lambda i, k: (i, 0)),   # x rows
                pl.BlockSpec((d_model, tk_eff), lambda i, k: (0, k)),   # W1 chunk
                pl.BlockSpec((1, tk_eff),       lambda i, k: (0, k)),   # b1 chunk
                pl.BlockSpec((tk_eff, d_model), lambda i, k: (k, 0)),   # W2 chunk
                pl.BlockSpec((1, d_model),      lambda i, k: (0, 0)),   # b2
            ],
            out_specs=pl.BlockSpec((tm_eff, d_model), lambda i, k: (i, 0)),
            scratch_shapes=[pltpu.VMEM((tm_eff, d_model), jnp.float32)],
        ),
        compiler_params=pltpu.CompilerParams(
            dimension_semantics=("parallel", "arbitrary"),
            vmem_limit_bytes=vmem_limit,
        ),
    )(x2d, w1, b1_2d, w2, b2_2d)

    if M_pad != M:
        out2d = out2d[:M]
    return out2d.reshape(*lead, d_model)


def init_params(key, d_model):
    """Deterministic init matching nn.Linear's default (uniform +-1/sqrt(fan_in))."""
    d_hidden = d_model * 4
    k1, k2, k3, k4 = jax.random.split(key, 4)
    bound1 = 1.0 / (d_model ** 0.5)
    bound2 = 1.0 / (d_hidden ** 0.5)
    # Stored as [in, out] (transpose of PyTorch's [out, in]) so the kernel does x @ W.
    w1 = jax.random.uniform(k1, (d_model, d_hidden), jnp.float32, -bound1, bound1)
    b1 = jax.random.uniform(k2, (d_hidden,), jnp.float32, -bound1, bound1)
    w2 = jax.random.uniform(k3, (d_hidden, d_model), jnp.float32, -bound2, bound2)
    b2 = jax.random.uniform(k4, (d_model,), jnp.float32, -bound2, bound2)
    return w1, b1, w2, b2


def _reference(x, w1, b1, w2, b2, compute_dtype=jnp.bfloat16):
    """Plain-JAX reference mirroring the kernel's bf16 operands / f32 accumulation."""
    lead = x.shape[:-1]
    d_model = x.shape[-1]
    M = math.prod(lead)
    xq = x.reshape(M, d_model).astype(compute_dtype).astype(jnp.float32)
    w1q = w1.astype(compute_dtype).astype(jnp.float32)
    w2q = w2.astype(compute_dtype).astype(jnp.float32)
    h = jnp.maximum(xq @ w1q + b1.astype(jnp.float32), 0.0)
    hq = h.astype(compute_dtype).astype(jnp.float32)
    y = hq @ w2q + b2.astype(jnp.float32)
    return y.reshape(x.shape)


if __name__ == "__main__":
    batch, seq, d_model = 2, 8, 128   # d_hidden = 512

    key = jax.random.PRNGKey(0)
    kx, kp = jax.random.split(key)
    x = jax.random.normal(kx, (batch, seq, d_model), jnp.float32)
    w1, b1, w2, b2 = init_params(kp, d_model)

    # One-time weight cast, hoisted out of the per-call path.
    w1c, b1c, w2c, b2c = prepare_ffn_params(w1, b1, w2, b2)

    ref = _reference(x, w1, b1, w2, b2)

    # 1) Auto tiling (weights resident; single hidden chunk at this size).
    out = jax.block_until_ready(positionwise_ffn(x, w1c, b1c, w2c, b2c))
    assert out.shape == x.shape and out.dtype == x.dtype
    assert jnp.allclose(out, ref, atol=5e-3, rtol=5e-3), "mismatch (auto tiles)"

    # 2) Explicit small tiles: exercises the multi-chunk accumulator path.
    out2 = jax.block_until_ready(
        positionwise_ffn(x, w1c, b1c, w2c, b2c, tm=16, tk=128))
    assert jnp.allclose(out2, ref, atol=5e-3, rtol=5e-3), "mismatch (chunked tiles)"

    # 3) Token count not a multiple of 16: exercises the bounded row padding.
    x3 = jax.random.normal(jax.random.PRNGKey(1), (3, 5, d_model), jnp.float32)
    ref3 = _reference(x3, w1, b1, w2, b2)
    out3 = jax.block_until_ready(positionwise_ffn(x3, w1c, b1c, w2c, b2c))
    assert jnp.allclose(out3, ref3, atol=5e-3, rtol=5e-3), "mismatch (padded rows)"

    print("KERNEL_OK")
</pallas_src>

<mosaic_0001>
module attributes {stable_mosaic.version = 11 : i64} {
  func.func @_ffn_kernel(%arg0: i32, %arg1: i32, %arg2: memref<16x128xf32, #tpu.memory_space<vmem>>, %arg3: memref<128x512xbf16, #tpu.memory_space<vmem>>, %arg4: memref<1x512xf32, #tpu.memory_space<vmem>>, %arg5: memref<512x128xbf16, #tpu.memory_space<vmem>>, %arg6: memref<1x128xf32, #tpu.memory_space<vmem>>, %arg7: memref<16x128xf32, #tpu.memory_space<vmem>>, %arg8: memref<16x128xf32, #tpu.memory_space<vmem>>) attributes {dimension_semantics = [#tpu.dimension_semantics<parallel>, #tpu.dimension_semantics<arbitrary>], iteration_bounds = array<i64: 1, 1>, scalar_prefetch = 0 : i64, scratch_operands = 1 : i64, tpu.core_type = #tpu.core_type<tc>, window_params = [{transform_indices = @transform_0, window_bounds = array<i64: 16, 128>}, {transform_indices = @transform_1, window_bounds = array<i64: 128, 512>}, {transform_indices = @transform_2, window_bounds = array<i64: 1, 512>}, {transform_indices = @transform_3, window_bounds = array<i64: 512, 128>}, {pipeline_mode = #tpu.pipeline_mode<synchronous>, transform_indices = @transform_4, window_bounds = array<i64: 1, 128>}, {transform_indices = @transform_5, window_bounds = array<i64: 16, 128>}]} {
    %c0_i32 = arith.constant 0 : i32
    %0 = arith.cmpi eq, %arg1, %c0_i32 : i32
    %1 = arith.extui %0 : i1 to i32
    %c0_i32_0 = arith.constant 0 : i32
    %2 = arith.cmpi ne, %1, %c0_i32_0 : i32
    scf.if %2 {
      %c0_16 = arith.constant 0 : index
      %c0_17 = arith.constant 0 : index
      %21 = vector.load %arg6[%c0_16, %c0_17] : memref<1x128xf32, #tpu.memory_space<vmem>>, vector<1x128xf32>
      %22 = vector.shape_cast %21 : vector<1x128xf32> to vector<1x128xf32>
      %23 = vector.broadcast %22 : vector<1x128xf32> to vector<16x128xf32>
      %c0_18 = arith.constant 0 : index
      %c0_19 = arith.constant 0 : index
      %24 = vector.load %arg8[%c0_18, %c0_19] : memref<16x128xf32, #tpu.memory_space<vmem>>, vector<16x128xf32>
      tpu.vector_store %arg8[%c0_18, %c0_19], %23 {strides = array<i32>} : memref<16x128xf32, #tpu.memory_space<vmem>>, vector<16x128xf32>,
    } else {
    }
    %c0 = arith.constant 0 : index
    %c0_1 = arith.constant 0 : index
    %3 = vector.load %arg2[%c0, %c0_1] : memref<16x128xf32, #tpu.memory_space<vmem>>, vector<16x128xf32>
    %4 = arith.truncf %3 : vector<16x128xf32> to vector<16x128xbf16>
    %c0_2 = arith.constant 0 : index
    %c0_3 = arith.constant 0 : index
    %5 = vector.load %arg3[%c0_2, %c0_3] : memref<128x512xbf16, #tpu.memory_space<vmem>>, vector<128x512xbf16>
    %cst = arith.constant dense<0.000000e+00> : vector<16x512xf32>
    %6 = tpu.matmul %4, %5, %cst {dimension_numbers = #tpu.dot_dimension_numbers<[1], [0], [0], [1], [0, 0, 1, 1], [], []>} : vector<16x128xbf16>, vector<128x512xbf16>, vector<16x512xf32> -> vector<16x512xf32>
    %c0_4 = arith.constant 0 : index
    %c0_5 = arith.constant 0 : index
    %7 = vector.load %arg4[%c0_4, %c0_5] : memref<1x512xf32, #tpu.memory_space<vmem>>, vector<1x512xf32>
    %8 = vector.broadcast %7 : vector<1x512xf32> to vector<16x512xf32>
    %9 = arith.addf %6, %8 : vector<16x512xf32>
    %cst_6 = arith.constant 0.000000e+00 : f32
    %10 = vector.broadcast %cst_6 : f32 to vector<16x512xf32>
    %11 = arith.maximumf %9, %10 : vector<16x512xf32>
    %c0_7 = arith.constant 0 : index
    %c0_8 = arith.constant 0 : index
    %12 = vector.load %arg8[%c0_7, %c0_8] : memref<16x128xf32, #tpu.memory_space<vmem>>, vector<16x128xf32>
    %13 = arith.truncf %11 : vector<16x512xf32> to vector<16x512xbf16>
    %c0_9 = arith.constant 0 : index
    %c0_10 = arith.constant 0 : index
    %14 = vector.load %arg5[%c0_9, %c0_10] : memref<512x128xbf16, #tpu.memory_space<vmem>>, vector<512x128xbf16>
    %cst_11 = arith.constant dense<0.000000e+00> : vector<16x128xf32>
    %15 = tpu.matmul %13, %14, %cst_11 {dimension_numbers = #tpu.dot_dimension_numbers<[1], [0], [0], [1], [0, 0, 1, 1], [], []>} : vector<16x512xbf16>, vector<512x128xbf16>, vector<16x128xf32> -> vector<16x128xf32>
    %16 = arith.addf %12, %15 : vector<16x128xf32>
    %c0_12 = arith.constant 0 : index
    %c0_13 = arith.constant 0 : index
    %17 = vector.load %arg8[%c0_12, %c0_13] : memref<16x128xf32, #tpu.memory_space<vmem>>, vector<16x128xf32>
    tpu.vector_store %arg8[%c0_12, %c0_13], %16 {strides = array<i32>} : memref<16x128xf32, #tpu.memory_space<vmem>>, vector<16x128xf32>,
    %c0_i32_14 = arith.constant 0 : i32
    %18 = arith.cmpi eq, %arg1, %c0_i32_14 : i32
    %19 = arith.extui %18 : i1 to i32
    %c0_i32_15 = arith.constant 0 : i32
    %20 = arith.cmpi ne, %19, %c0_i32_15 : i32
    scf.if %20 {
      %c0_16 = arith.constant 0 : index
      %c0_17 = arith.constant 0 : index
      %21 = vector.load %arg8[%c0_16, %c0_17] : memref<16x128xf32, #tpu.memory_space<vmem>>, vector<16x128xf32>
      %c0_18 = arith.constant 0 : index
      %c0_19 = arith.constant 0 : index
      %22 = vector.load %arg7[%c0_18, %c0_19] : memref<16x128xf32, #tpu.memory_space<vmem>>, vector<16x128xf32>
      tpu.vector_store %arg7[%c0_18, %c0_19], %21 {strides = array<i32>} : memref<16x128xf32, #tpu.memory_space<vmem>>, vector<16x128xf32>,
    } else {
    }
    return
  }
  func.func @transform_0(%arg0: i32, %arg1: i32) -> (i32, i32) {
    %c0_i32 = arith.constant 0 : i32
    %c0_i32_0 = arith.constant 0 : i32
    return %arg0, %c0_i32 : i32, i32
  }
  func.func @transform_1(%arg0: i32, %arg1: i32) -> (i32, i32) {
    %c0_i32 = arith.constant 0 : i32
    %c0_i32_0 = arith.constant 0 : i32
    return %c0_i32, %arg1 : i32, i32
  }
  func.func @transform_2(%arg0: i32, %arg1: i32) -> (i32, i32) {
    %c0_i32 = arith.constant 0 : i32
    %c0_i32_0 = arith.constant 0 : i32
    return %c0_i32, %arg1 : i32, i32
  }
  func.func @transform_3(%arg0: i32, %arg1: i32) -> (i32, i32) {
    %c0_i32 = arith.constant 0 : i32
    %c0_i32_0 = arith.constant 0 : i32
    return %arg1, %c0_i32 : i32, i32
  }
  func.func @transform_4(%arg0: i32, %arg1: i32) -> (i32, i32) {
    %c0_i32 = arith.constant 0 : i32
    %c0_i32_0 = arith.constant 0 : i32
    %c0_i32_1 = arith.constant 0 : i32
    return %c0_i32, %c0_i32_0 : i32, i32
  }
  func.func @transform_5(%arg0: i32, %arg1: i32) -> (i32, i32) {
    %c0_i32 = arith.constant 0 : i32
    %c0_i32_0 = arith.constant 0 : i32
    return %arg0, %c0_i32 : i32, i32
  }
}

</mosaic_0001>

<bundles_post_ra>
// kernel: tpu_custom_call.1
= control target key start
LH: loop header
LB: loop body
LE: loop exit
PB: predicated region body
PF: predicated region fallthrough
CT: control target
= control target key end

     0   :  { %10 = vsyncpa [#allocation4], 0  ;;  %s1148_s0 = inlined_call_operand.hbm [shape: f32[16,128], index: 0, kind: input, shape index: {}]   ;;  %s1149_s1 = inlined_call_operand.hbm [shape: bf16[128,512], index: 1, kind: input, shape index: {}]   ;;  %s1150_s2 = inlined_call_operand.hbm [shape: f32[1,512], index: 2, kind: input, shape index: {}]   ;;  %s1151_s3 = inlined_call_operand.hbm [shape: bf16[512,128], index: 3, kind: input, shape index: {}]   ;;  %s1152_s4 = inlined_call_operand.vmem [shape: f32[1,128], index: 4, kind: input, shape index: {}]   ;;  %s1153_s5 = inlined_call_operand.hbm [shape: f32[16,128], index: 5, kind: output, shape index: {}]  }
   0x1   :  { %11 = vsyncpa [#allocation7], 0 }
   0x2   :  { %12 = vsyncpa [#allocation10], 0 }
   0x3   :  { %13 = vsyncpa [#allocation5], 0  ;;  %s1082_s18 = smov [#allocation6]  }
   0x4   :  { %s31_s19 = sshll.u32 %s1082_s18, 4  ;;  %s32_s19 = int_to_ptr.vmem [resolvable:$true] %s31_s19 }
   0x5   :  { %s982_s20 = scalar_lea.vmem %s32_s19, 4096  ;;  %p987_p1 = scmp.lt.s32.totalorder %s32_s19, %s32_s19 }
   0x6   :  { %p983_p0 = scmp.ne.s32.totalorder %s32_s19, %s982_s20  ;;  %p988_p2 = scmp.lt.s32.totalorder %s982_s20, %s982_s20 }
   0x8   :  { %p989_p3 = por %p988_p2, %p987_p1 }
   0xa   :  { %p990_p4 = pnand %p989_p3, %p983_p0 }
   0xc   :  { %993 = shalt.err (!%p990_p4)
}
   0xd   :  { %s1083_s21 = smov 256   ;;  %s1084_s22 = smov 16  }
   0xe   :  { %37 = dma.hbm_to_vmem [thread:$0]  %s1149_s1, 4096, %s32_s19, [#allocation7], %s1083_s21, %s1083_s21, %s1084_s22  }
   0xf   :  { %s1085_s25 = smov [#allocation3]  }
  0x10   :  { %s19_s26 = sshll.u32 %s1085_s25, 4  ;;  %s20_s26 = int_to_ptr.vmem [resolvable:$true] %s19_s26 }
  0x11   :  { %s1002_s27 = scalar_lea.vmem %s20_s26, 256  ;;  %p1007_p6 = scmp.lt.s32.totalorder %s20_s26, %s20_s26 }
  0x12   :  { %p1003_p5 = scmp.ne.s32.totalorder %s20_s26, %s1002_s27  ;;  %p1008_p7 = scmp.lt.s32.totalorder %s1002_s27, %s1002_s27 }
  0x14   :  { %p1009_p8 = por %p1008_p7, %p1007_p6 }
  0x16   :  { %p1010_p9 = pnand %p1009_p8, %p1003_p5 }
  0x18   :  { %1013 = shalt.err (!%p1010_p9)
}
  0x19   :  { %s1086_s28 = smov 128   ;;  %s1087_s29 = smov 8  }
  0x1a   :  { %25 = dma.hbm_to_vmem [thread:$0]  %s1148_s0, 256, %s20_s26, [#allocation4], %s1086_s28, %s1086_s28, %s1087_s29  }
  0x1b   :  { %s1088_s1 = smov [#allocation8]   ;;  %s1089_s8 = smov [#allocation9]  }
  0x1c   :  { %s44_s7 = sshll.u32 %s1088_s1, 4  ;;  %s53_s9 = sshll.u32 %s1089_s8, 4  ;;  %s45_s7 = int_to_ptr.vmem [resolvable:$true] %s44_s7  ;;  %s54_s9 = int_to_ptr.vmem [resolvable:$true] %s53_s9 }
  0x1d   :  { %s1022_s10 = scalar_lea.vmem %s45_s7, 64  ;;  %p1027_p11 = scmp.lt.s32.totalorder %s45_s7, %s45_s7 }
  0x1e   :  { %p1023_p10 = scmp.ne.s32.totalorder %s45_s7, %s1022_s10  ;;  %p1028_p12 = scmp.lt.s32.totalorder %s1022_s10, %s1022_s10 }
  0x20   :  { %p1029_p13 = por %p1028_p12, %p1027_p11 }
  0x22   :  { %p1030_p0 = pnand %p1029_p13, %p1023_p10 }
  0x24   :  { %1033 = shalt.err (!%p1030_p0)
}
  0x25   :  { %47 = dma.hbm_to_vmem [thread:$0]  %s1150_s2, 64, %s45_s7, [#allocation7]  }
  0x26   :  { %s1042_s13 = scalar_lea.vmem %s54_s9, 4096  ;;  %p1047_p2 = scmp.lt.s32.totalorder %s54_s9, %s54_s9 }
  0x27   :  { %p1043_p1 = scmp.ne.s32.totalorder %s54_s9, %s1042_s13  ;;  %p1048_p3 = scmp.lt.s32.totalorder %s1042_s13, %s1042_s13 }
  0x29   :  { %p1049_p4 = por %p1048_p3, %p1047_p2 }
  0x2b   :  { %p1050_p5 = pnand %p1049_p4, %p1043_p1 }
  0x2d   :  { %1053 = shalt.err (!%p1050_p5)
}
  0x2e   :  { %s1090_s0 = smov 64   ;;  %s1091_s14 = smov 4  }
  0x2f   :  { %59 = dma.hbm_to_vmem [thread:$0]  %s1151_s3, 4096, %s54_s9, [#allocation10], %s1090_s0, %s1090_s0, %s1091_s14  }
  0x30   :  { %1074 = dma.done.wait [#allocation4], 256  }
  0x31   :  { %1075 = vsyncadd [#allocation4], 4294967040 }
  0x32   :  { %1076 = dma.done.wait [#allocation7], 4160  }
  0x33   :  { %1077 = vsyncadd [#allocation7], 4294963136 }
  0x34   :  { %1078 = dma.done.wait [#allocation10], 4096  }
  0x35   :  { %1079 = vsyncadd [#allocation10], 4294963200  ;;  %v1092_v0 = vmov 0   ;;  %v894_v1 = vld [vmem:[#allocation6 + $0xe4] ss:$16 sps:$4 sm:$0xff]   ;;  %v89_v34 = vld [vmem:[#allocation3 + $0x8] sm:$0xff] }
  0x36   :  { %337 = vmatprep.mubr.bf16.mxu0 %v1092_v0  ;;  %380 = vmatprep.mubr.bf16.mxu1 %v1092_v0  ;;  %v896_v2 = vld [vmem:[#allocation6 + $0xec] ss:$16 sps:$4 sm:$0xff]   ;;  %v898_v3 = vld [vmem:[#allocation6 + $0xe0] ss:$16 sps:$4 sm:$0xff]   ;;  %v899_v4 = vld [vmem:[#allocation6 + $0xe8] ss:$16 sps:$4 sm:$0xff]  }
  0x37   :  { %305 = vmatprep.subr.bf16.mxu0 %v894_v1  ;;  %348 = vmatprep.subr.bf16.mxu1 %v896_v2  ;;  %v900_v5 = vld [vmem:[#allocation6 + $0xc4] ss:$16 sps:$4 sm:$0xff]   ;;  %v902_v6 = vld [vmem:[#allocation6 + $0xcc] ss:$16 sps:$4 sm:$0xff]   ;;  %v904_v7 = vld [vmem:[#allocation6 + $0xc0] ss:$16 sps:$4 sm:$0xff]  }
  0x38   :  { %306 = vmatpush1.bf16.msra.mxu0 %v898_v3  ;;  %349 = vmatpush1.bf16.msra.mxu1 %v899_v4  ;;  %v905_v8 = vld [vmem:[#allocation6 + $0xc8] ss:$16 sps:$4 sm:$0xff]   ;;  %v906_v9 = vld [vmem:[#allocation6 + $0xa4] ss:$16 sps:$4 sm:$0xff]   ;;  %v908_v10 = vld [vmem:[#allocation6 + $0xac] ss:$16 sps:$4 sm:$0xff]   ;;  %v125_v4 = vlaneseq }
  0x39   :  { %307 = vmatprep.subr.bf16.mxu0 %v900_v5  ;;  %350 = vmatprep.subr.bf16.mxu1 %v902_v6  ;;  %v910_v11 = vld [vmem:[#allocation6 + $0xa0] ss:$16 sps:$4 sm:$0xff]   ;;  %v911_v12 = vld [vmem:[#allocation6 + $0xa8] ss:$16 sps:$4 sm:$0xff]   ;;  %v912_v13 = vld [vmem:[#allocation6 + $0x84] ss:$16 sps:$4 sm:$0xff]  }
  0x3a   :  { %v914_v14 = vld [vmem:[#allocation6 + $0x8c] ss:$16 sps:$4 sm:$0xff]   ;;  %v916_v15 = vld [vmem:[#allocation6 + $0x80] ss:$16 sps:$4 sm:$0xff]   ;;  %v917_v16 = vld [vmem:[#allocation6 + $0x88] ss:$16 sps:$4 sm:$0xff]  }
  0x3b   :  { %v918_v17 = vld [vmem:[#allocation6 + $0x64] ss:$16 sps:$4 sm:$0xff]   ;;  %v920_v18 = vld [vmem:[#allocation6 + $0x6c] ss:$16 sps:$4 sm:$0xff]   ;;  %v922_v19 = vld [vmem:[#allocation6 + $0x60] ss:$16 sps:$4 sm:$0xff]  }
  0x3c   :  { %308 = vmatpush1.bf16.msra.mxu0 %v904_v7  ;;  %351 = vmatpush1.bf16.msra.mxu1 %v905_v8  ;;  %v923_v20 = vld [vmem:[#allocation6 + $0x68] ss:$16 sps:$4 sm:$0xff]   ;;  %v924_v21 = vld [vmem:[#allocation6 + $0x44] ss:$16 sps:$4 sm:$0xff]   ;;  %v926_v22 = vld [vmem:[#allocation6 + $0x4c] ss:$16 sps:$4 sm:$0xff]  }
  0x3d   :  { %309 = vmatprep.subr.bf16.mxu0 %v906_v9  ;;  %352 = vmatprep.subr.bf16.mxu1 %v908_v10  ;;  %v928_v23 = vld [vmem:[#allocation6 + $0x40] ss:$16 sps:$4 sm:$0xff]   ;;  %v929_v24 = vld [vmem:[#allocation6 + $0x48] ss:$16 sps:$4 sm:$0xff]   ;;  %v930_v25 = vld [vmem:[#allocation6 + $0x24] ss:$16 sps:$4 sm:$0xff]  }
  0x3e   :  { %v932_v26 = vld [vmem:[#allocation6 + $0x2c] ss:$16 sps:$4 sm:$0xff]   ;;  %v934_v27 = vld [vmem:[#allocation6 + $0x20] ss:$16 sps:$4 sm:$0xff]   ;;  %v935_v28 = vld [vmem:[#allocation6 + $0x28] ss:$16 sps:$4 sm:$0xff]  }
  0x3f   :  { %v936_v29 = vld [vmem:[#allocation6 + $0x4] ss:$16 sps:$4 sm:$0xff]   ;;  %v938_v30 = vld [vmem:[#allocation6 + $0xc] ss:$16 sps:$4 sm:$0xff]   ;;  %v940_v31 = vld [vmem:[#allocation6] ss:$16 sps:$4 sm:$0xff]  }
  0x40   :  { %310 = vmatpush1.bf16.msra.mxu0 %v910_v11  ;;  %353 = vmatpush1.bf16.msra.mxu1 %v911_v12  ;;  %v941_v32 = vld [vmem:[#allocation6 + $0x8] ss:$16 sps:$4 sm:$0xff]   ;;  %v88_v33 = vld [vmem:[#allocation3] sm:$0xff]  ;;  %v942_v35 = vld [vmem:[#allocation9 + $0x78] sm:$0xff]   ;;  %v126_v5 = vshrl.u32 %v125_v4, 7  ;;  %s1093_s17 = smov [#allocation11]  }
  0x41   :  { %311 = vmatprep.subr.bf16.mxu0 %v912_v13  ;;  %354 = vmatprep.subr.bf16.mxu1 %v914_v14  ;;  %v943_v36 = vld [vmem:[#allocation9 + $0xf8] sm:$0xff]   ;;  %v90_v38 = vpack.c.bf16 %v89_v34, %v88_v33  ;;  %v946_v40 = vld [vmem:[#allocation9 + $0x70] sm:$0xff]   ;;  %v950_v44 = vld [vmem:[#allocation9 + $0x68] sm:$0xff]   ;;  %s759_s18 = sshll.u32 %s1093_s17, 4  ;;  %s760_s18 = int_to_ptr.vmem [resolvable:$true] %s759_s18 }
  0x42   :  { %v944_v37 = vld [vmem:[#allocation9 + $0x38] sm:$0xff]   ;;  %v947_v41 = vld [vmem:[#allocation9 + $0xf0] sm:$0xff]   ;;  %v951_v45 = vld [vmem:[#allocation9 + $0xe8] sm:$0xff]   ;;  %v131_v6 = vsub.s32 1, %v126_v5  ;;  %v139_v7 = vsub.s32 3, %v126_v5  ;;  %v127_v8 = vsub.s32 0, %v126_v5  ;;  %p1059_p7 = scmp.lt.s32.totalorder %s760_s18, %s760_s18 }
  0x43   :  { %v945_v39 = vld [vmem:[#allocation9 + $0xb8] sm:$0xff]   ;;  %v948_v42 = vld [vmem:[#allocation9 + $0x30] sm:$0xff]   ;;  %v952_v46 = vld [vmem:[#allocation9 + $0x28] sm:$0xff]   ;;  %v135_v9 = vsub.s32 2, %v126_v5  ;;  %s1054_s19 = scalar_lea.vmem %s760_s18, 256 }
  0x44   :  { %312 = vmatpush1.bf16.msra.mxu0 %v916_v15  ;;  %355 = vmatpush1.bf16.msra.mxu1 %v917_v16  ;;  %v949_v43 = vld [vmem:[#allocation9 + $0xb0] sm:$0xff]   ;;  %v953_v47 = vld [vmem:[#allocation9 + $0xa8] sm:$0xff]   ;;  %v954_v48 = vld [vmem:[#allocation9 + $0x60] sm:$0xff]   ;;  %p1055_p6 = scmp.ne.s32.totalorder %s760_s18, %s1054_s19  ;;  %p1060_p8 = scmp.lt.s32.totalorder %s1054_s19, %s1054_s19 }
  0x45   :  { %313 = vmatprep.subr.bf16.mxu0 %v918_v17  ;;  %356 = vmatprep.subr.bf16.mxu1 %v920_v18  ;;  %v955_v49 = vld [vmem:[#allocation9 + $0xe0] sm:$0xff]   ;;  %v958_v52 = vld [vmem:[#allocation9 + $0x58] sm:$0xff]   ;;  %v962_v56 = vld [vmem:[#allocation9 + $0x50] sm:$0xff]  }
  0x46   :  { %v956_v50 = vld [vmem:[#allocation9 + $0x20] sm:$0xff]   ;;  %v959_v53 = vld [vmem:[#allocation9 + $0xd8] sm:$0xff]   ;;  %v963_v57 = vld [vmem:[#allocation9 + $0xd0] sm:$0xff]   ;;  %p1061_p9 = por %p1060_p8, %p1059_p7 }
  0x47   :  { %v957_v51 = vld [vmem:[#allocation9 + $0xa0] sm:$0xff]   ;;  %v960_v54 = vld [vmem:[#allocation9 + $0x18] sm:$0xff]   ;;  %v964_v58 = vld [vmem:[#allocation9 + $0x10] sm:$0xff]  }
  0x48   :  { %314 = vmatpush1.bf16.msra.mxu0 %v922_v19  ;;  %357 = vmatpush1.bf16.msra.mxu1 %v923_v20  ;;  %v961_v55 = vld [vmem:[#allocation9 + $0x98] sm:$0xff]   ;;  %v965_v59 = vld [vmem:[#allocation9 + $0x90] sm:$0xff]   ;;  %v966_v60 = vld [vmem:[#allocation9 + $0x48] sm:$0xff]   ;;  %p1062_p10 = pnand %p1061_p9, %p1055_p6 }
  0x49   :  { %315 = vmatprep.subr.bf16.mxu0 %v924_v21  ;;  %358 = vmatprep.subr.bf16.mxu1 %v926_v22  ;;  %v967_v61 = vld [vmem:[#allocation9 + $0xc8] sm:$0xff]   ;;  %v970_v0 = vld [vmem:[#allocation9 + $0x40] sm:$0xff]   ;;  %v123_v10 = vld [vmem:[#allocation8] sm:$0xf] }
  0x4a   :  { %v968_v62 = vld [vmem:[#allocation9 + $0x8] sm:$0xff]   ;;  %v971_v1 = vld [vmem:[#allocation9 + $0xc0] sm:$0xff]   ;;  %v132_v13 = vrot.slane %v123_v10, %v131_v6  ;;  %v140_v14 = vrot.slane %v123_v10, %v139_v7  ;;  %v128_v15 = vrot.slane %v123_v10, %v127_v8  ;;  %v136_v16 = vrot.slane %v123_v10, %v135_v9 }
  0x4b   :  { %v969_v63 = vld [vmem:[#allocation9 + $0x88] sm:$0xff]   ;;  %v972_v2 = vld [vmem:[#allocation9] sm:$0xff]  }
  0x4c   :  { %316 = vmatpush1.bf16.msra.mxu0 %v928_v23  ;;  %359 = vmatpush1.bf16.msra.mxu1 %v929_v24  ;;  %v973_v3 = vld [vmem:[#allocation9 + $0x80] sm:$0xff]  }
  0x4d   :  { %317 = vmatprep.subr.bf16.mxu0 %v930_v25  ;;  %360 = vmatprep.subr.bf16.mxu1 %v932_v26 }
  0x50   :  { %318 = vmatpush1.bf16.msra.mxu0 %v934_v27  ;;  %361 = vmatpush1.bf16.msra.mxu1 %v935_v28 }
  0x51   :  { %319 = vmatprep.subr.bf16.mxu0 %v936_v29  ;;  %362 = vmatprep.subr.bf16.mxu1 %v938_v30 }
  0x54   :  { %320 = vmatpush1.bf16.msra.mxu0 %v940_v31  ;;  %363 = vmatpush1.bf16.msra.mxu1 %v941_v32 }
  0x55   :  { %838 = vmatprep.subr.bf16.mxu0 %v942_v35  ;;  %860 = vmatprep.subr.bf16.mxu1 %v943_v36 }
  0x57   :  { %338 = vmatmul.mubr.bf16.vlgmr.msra.gmra.mxu0 %v90_v38  ;;  %381 = vmatmul.mubr.bf16.vlgmr.msra.gmra.mxu1 %v90_v38 }
  0x58   :  { %839 = vmatpush3.bf16.msra.mxu0 %v944_v37  ;;  %861 = vmatpush3.bf16.msra.mxu1 %v945_v39 }
  0x59   :  { %840 = vmatprep.subr.bf16.mxu0 %v946_v40  ;;  %862 = vmatprep.subr.bf16.mxu1 %v947_v41 }
  0x5c   :  { %841 = vmatpush3.bf16.msra.mxu0 %v948_v42  ;;  %863 = vmatpush3.bf16.msra.mxu1 %v949_v43 }
  0x5d   :  { %842 = vmatprep.subr.bf16.mxu0 %v950_v44  ;;  %864 = vmatprep.subr.bf16.mxu1 %v951_v45 }
  0x60   :  { %843 = vmatpush3.bf16.msra.mxu0 %v952_v46  ;;  %865 = vmatpush3.bf16.msra.mxu1 %v953_v47 }
  0x61   :  { %844 = vmatprep.subr.bf16.mxu0 %v954_v48  ;;  %866 = vmatprep.subr.bf16.mxu1 %v955_v49  ;;  %v773_v49 = vld [vmem:[%s1152_s4] ss:$0 sm:$0xff] }
  0x64   :  { %845 = vmatpush3.bf16.msra.mxu0 %v956_v50  ;;  %867 = vmatpush3.bf16.msra.mxu1 %v957_v51 }
  0x65   :  { %846 = vmatprep.subr.bf16.mxu0 %v958_v52  ;;  %868 = vmatprep.subr.bf16.mxu1 %v959_v53 }
  0x68   :  { %847 = vmatpush3.bf16.msra.mxu0 %v960_v54  ;;  %869 = vmatpush3.bf16.msra.mxu1 %v961_v55 }
  0x69   :  { %848 = vmatprep.subr.bf16.mxu0 %v962_v56  ;;  %870 = vmatprep.subr.bf16.mxu1 %v963_v57 }
  0x6c   :  { %849 = vmatpush3.bf16.msra.mxu0 %v964_v58  ;;  %871 = vmatpush3.bf16.msra.mxu1 %v965_v59 }
  0x6d   :  { %850 = vmatprep.subr.bf16.mxu0 %v966_v60  ;;  %872 = vmatprep.subr.bf16.mxu1 %v967_v61 }
  0x70   :  { %851 = vmatpush3.bf16.msra.mxu0 %v968_v62  ;;  %873 = vmatpush3.bf16.msra.mxu1 %v969_v63 }
  0x71   :  { %852 = vmatprep.subr.bf16.mxu0 %v970_v0  ;;  %874 = vmatprep.subr.bf16.mxu1 %v971_v1 }
  0x74   :  { %853 = vmatpush3.bf16.msra.mxu0 %v972_v2  ;;  %875 = vmatpush3.bf16.msra.mxu1 %v973_v3 }
 0x117   :  { %v339_v11 = vpop.f32.mrf.mxu0  ;;  %v382_v12 = vpop.f32.mrf.mxu1 }
 0x118   :  { %v340_v25 = vadd.f32 %v339_v11, %v128_v15  ;;  %v383_v26 = vadd.f32 %v382_v12, %v136_v16 }
 0x119   :  { %v341_v17 = vpop.f32.mrf.mxu0  ;;  %v384_v18 = vpop.f32.mrf.mxu1 }
 0x11a   :  { %v342_v21 = vadd.f32 %v341_v17, %v132_v13  ;;  %v385_v22 = vadd.f32 %v384_v18, %v140_v14  ;;  %v391_v37 = vmax.f32 %v340_v25, 0.0  ;;  %v393_v38 = vmax.f32 %v383_v26, 0.0 }
 0x11b   :  { %v343_v19 = vpop.f32.mrf.mxu0  ;;  %v386_v20 = vpop.f32.mrf.mxu1 }
 0x11c   :  { %v344_v23 = vadd.f32 %v343_v19, %v128_v15  ;;  %v387_v24 = vadd.f32 %v386_v20, %v136_v16  ;;  %v392_v33 = vmax.f32 %v342_v21, 0.0  ;;  %v394_v34 = vmax.f32 %v385_v22, 0.0 }
 0x11d   :  { %v345_v27 = vpop.f32.mrf.mxu0  ;;  %v388_v28 = vpop.f32.mrf.mxu1 }
 0x11e   :  { %v346_v29 = vadd.f32 %v345_v27, %v132_v13  ;;  %v389_v30 = vadd.f32 %v388_v28, %v140_v14  ;;  %v395_v31 = vmax.f32 %v344_v23, 0.0  ;;  %v397_v32 = vmax.f32 %v387_v24, 0.0 }
 0x120   :  { %v396_v35 = vmax.f32 %v346_v29, 0.0  ;;  %v398_v36 = vmax.f32 %v389_v30, 0.0  ;;  %v401_v41 = vpack.c.bf16 %v395_v31, %v391_v37  ;;  %v403_v42 = vpack.c.bf16 %v397_v32, %v393_v38 }
 0x122   :  { %v402_v39 = vpack.c.bf16 %v396_v35, %v392_v33  ;;  %v404_v40 = vpack.c.bf16 %v398_v36, %v394_v34 }
 0x124   :  { %693 = vmatprep.mubr.bf16.mxu0 %v402_v39  ;;  %734 = vmatprep.mubr.bf16.mxu1 %v404_v40 }
 0x125   :  { %694 = vmatmul.mubr.bf16.vlgmr.msra.gmra.mxu0 %v401_v41  ;;  %735 = vmatmul.mubr.bf16.vlgmr.msra.gmra.mxu1 %v403_v42 }
 0x1e5   :  { %v854_v43 = vpop.f32.mrf.mxu0  ;;  %v876_v44 = vpop.f32.mrf.mxu1 }
 0x1e7   :  { %v855_v45 = vpop.f32.mrf.mxu0  ;;  %v877_v46 = vpop.f32.mrf.mxu1 }
 0x1e8   :  { %v856_v47 = vadd.f32 %v855_v45, %v854_v43  ;;  %v878_v48 = vadd.f32 %v877_v46, %v876_v44 }
 0x1e9   :  { %v857_v50 = vpop.f32.mrf.mxu0  ;;  %v879_v51 = vpop.f32.mrf.mxu1 }
 0x1ea   :  { %v737_v52 = vadd.f32 %v878_v48, %v856_v47 }
 0x1eb   :  { %v858_v53 = vpop.f32.mrf.mxu0  ;;  %v880_v54 = vpop.f32.mrf.mxu1 }
 0x1ec   :  { %v743_v55 = vadd.f32 %v773_v49, %v737_v52  ;;  %v859_v56 = vadd.f32 %v858_v53, %v857_v50  ;;  %v881_v57 = vadd.f32 %v880_v54, %v879_v51 }
 0x1ee   :  { %752 = vst [vmem:[#allocation11] sm:$0xff] %v743_v55  ;;  %v740_v58 = vadd.f32 %v881_v57, %v859_v56 }
 0x1f0   :  { %v744_v59 = vadd.f32 %v773_v49, %v740_v58 }
 0x1f2   :  { %753 = vst [vmem:[#allocation11 + $0x8] sm:$0xff] %v744_v59 }
 0x1f3   :  { %1065 = shalt.err (!%p1062_p10)
}
 0x1f4   :  { %765 = dma.vmem_to_hbm [thread:$0]  %s760_s18, 256, %s1153_s5, [#allocation5], %s1086_s28, %s1086_s28, %s1087_s29  }
 0x1f5   :  { %1080 = dma.done.wait [#allocation5], 256  }
 0x1f6   :  { %1081 = vsyncadd [#allocation5], 4294967040 }
 0x1f7   :  { %769 = vsyncpa [#allocation4], 1 }
 0x1f8   :  { %770 = vsyncpa [#allocation7], 1 }
 0x1f9   :  { %771 = vsyncpa [#allocation10], 1 }
 0x1fa   :  { %772 = vsyncpa [#allocation5], 1 }

</bundles_post_ra>
